<compile_context>
chip_gen: v7x
topology: tpu7x:2x2x1
jax: 0.10.0
libtpu: 0.0.40
codegen_flags: <defaults>
</compile_context>

<pallas_src>
import functools

import jax
import jax.numpy as jnp
import numpy as np
from jax.experimental import pallas as pl
from jax.experimental.pallas import tpu as pltpu


# ----------------------------------------------------------------------------
# Kernel (transposed layout: activations are (features, batch_tile))
# ----------------------------------------------------------------------------
def _mlp_kernel(*refs, num_layers, has_weights):
    """Fused MLP forward on one batch tile.

    refs layout:
      x_ref                                  # (in_features, TB)
      w0_ref, b0_ref, ..., w{L-1}_ref, b{L-1}_ref
                                             # W: (fan_out, fan_in), b: (fan_out, 1)
      [wmul_ref]                             # optional (out_features, TB)
      out_ref                                # (out_features, TB)
    """
    x_ref = refs[0]
    param_refs = refs[1:1 + 2 * num_layers]
    wmul_ref = refs[1 + 2 * num_layers] if has_weights else None
    out_ref = refs[-1]

    h = x_ref[...]                                     # (in_features, TB)
    for layer in range(num_layers):
        w = param_refs[2 * layer][...]                 # (fan_out, fan_in)
        b = param_refs[2 * layer + 1][...]             # (fan_out, 1)
        h = jnp.dot(w, h, preferred_element_type=jnp.float32) + b
        if layer < num_layers - 1:                     # outermost_linear=True
            h = jnp.maximum(h, 0.0)                    # ReLU

    if has_weights:
        h = h * wmul_ref[...]

    out_ref[...] = h.astype(out_ref.dtype)


# ----------------------------------------------------------------------------
# Wrapper
# ----------------------------------------------------------------------------
def _round_up(x, m):
    return (x + m - 1) // m * m


def mlp_forward(coords, params, weights=None, *, tb_max=1024):
    """Fused MLP forward.

    coords : (B, in_features)
    params : list of (W, b); W is (fan_out, fan_in) [PyTorch-native layout],
             b is (fan_out, 1)
    weights: optional (B, out_features) element-wise output multiplier
    """
    B, in_features = coords.shape
    out_features = params[-1][0].shape[0]
    num_layers = len(params)
    has_weights = weights is not None

    # Batch tile: lane-aligned (multiple of 128), as large as useful.
    b_pad_min = _round_up(B, 128)
    TB = min(tb_max, b_pad_min)
    B_pad = _round_up(B, TB)
    grid = (B_pad // TB,)

    # Transpose to lane-dense layout and zero-pad the batch (lane) axis.
    coords_t = jnp.pad(coords.T, ((0, 0), (0, B_pad - B)))      # (in, B_pad)

    in_specs = [pl.BlockSpec((in_features, TB), lambda i: (0, i))]
    args = [coords_t]
    for (w, b) in params:
        # Constant block index -> parameters stay resident in VMEM.
        in_specs.append(pl.BlockSpec(w.shape, lambda i: (0, 0)))
        in_specs.append(pl.BlockSpec(b.shape, lambda i: (0, 0)))
        args.extend([w, b])
    if has_weights:
        wmul_t = jnp.pad(weights.T, ((0, 0), (0, B_pad - B)))    # (out, B_pad)
        in_specs.append(pl.BlockSpec((out_features, TB), lambda i: (0, i)))
        args.append(wmul_t)

    out_shape = jax.ShapeDtypeStruct((out_features, B_pad), coords.dtype)
    out_spec = pl.BlockSpec((out_features, TB), lambda i: (0, i))

    kernel = functools.partial(
        _mlp_kernel, num_layers=num_layers, has_weights=has_weights
    )

    # Advisory cost estimate (cheap, memory-light kernel).
    flops = 2 * B_pad * sum(w.shape[0] * w.shape[1] for (w, _) in params)
    bytes_accessed = (
        coords_t.size * coords_t.dtype.itemsize
        + sum(w.size * w.dtype.itemsize + b.size * b.dtype.itemsize
              for (w, b) in params)
        + out_features * B_pad * coords.dtype.itemsize
        + (out_features * B_pad * coords.dtype.itemsize if has_weights else 0)
    )
    cost = pl.CostEstimate(flops=flops, transcendentals=0,
                           bytes_accessed=bytes_accessed)

    out_t = pl.pallas_call(
        kernel,
        out_shape=out_shape,
        grid=grid,
        in_specs=in_specs,
        out_specs=out_spec,
        compiler_params=pltpu.CompilerParams(
            dimension_semantics=("parallel",),   # shard batch tiles across TCs
            vmem_limit_bytes=32 * 1024 * 1024,   # explicit, portable budget
        ),
        cost_estimate=cost,
    )(*args)

    # Back to PyTorch convention, dropping the padded batch columns.
    return out_t[:, :B].T


# ----------------------------------------------------------------------------
# Deterministic parameter initialization (mirrors init_weights_normal:
# kaiming_normal fan_in / relu -> std = sqrt(2 / fan_in); PyTorch default
# uniform bias init U(-1/sqrt(fan_in), 1/sqrt(fan_in))).
# Weights are stored PyTorch-native: (fan_out, fan_in).  Bias: (fan_out, 1).
# ----------------------------------------------------------------------------
def init_mlp_params(key, in_features, out_features, num_hidden_layers,
                    hidden_features):
    dims = [in_features] + [hidden_features] * (num_hidden_layers + 1) \
           + [out_features]
    params = []
    for fan_in, fan_out in zip(dims[:-1], dims[1:]):
        key, kw, kb = jax.random.split(key, 3)
        std = np.sqrt(2.0 / fan_in)
        w = std * jax.random.normal(kw, (fan_out, fan_in), dtype=jnp.float32)
        bound = 1.0 / np.sqrt(fan_in)
        b = jax.random.uniform(kb, (fan_out, 1), dtype=jnp.float32,
                               minval=-bound, maxval=bound)
        params.append((w, b))
    return params


# ----------------------------------------------------------------------------
# Pure-JAX reference (PyTorch convention: y = x @ W.T + b)
# ----------------------------------------------------------------------------
def mlp_reference(coords, params, weights=None):
    h = coords
    for i, (w, b) in enumerate(params):
        h = h @ w.T + b.reshape(1, -1)
        if i < len(params) - 1:
            h = jnp.maximum(h, 0.0)
    if weights is not None:
        h = h * weights
    return h


if __name__ == "__main__":
    # Module config (matching the advect1D use-case: small coordinate MLP)
    in_features = 2
    out_features = 1
    num_hidden_layers = 2
    hidden_features = 32
    batch = 16

    key = jax.random.PRNGKey(0)
    key, kx, kw = jax.random.split(key, 3)

    coords = jax.random.normal(kx, (batch, in_features), dtype=jnp.float32)
    mul_weights = jax.random.normal(kw, (batch, out_features),
                                    dtype=jnp.float32)

    params = init_mlp_params(jax.random.PRNGKey(0), in_features, out_features,
                             num_hidden_layers, hidden_features)

    # Run kernel (both with and without the optional `weights` multiplier)
    out_plain = mlp_forward(coords, params, weights=None)
    out_weighted = mlp_forward(coords, params, weights=mul_weights)
    jax.block_until_ready(out_plain)
    jax.block_until_ready(out_weighted)

    # Also exercise the multi-tile path (batch not a multiple of the tile).
    big_batch = 1000
    key, kbx, kbw = jax.random.split(key, 3)
    big_coords = jax.random.normal(kbx, (big_batch, in_features),
                                   dtype=jnp.float32)
    big_mul = jax.random.normal(kbw, (big_batch, out_features),
                                dtype=jnp.float32)
    out_big = mlp_forward(big_coords, params, weights=big_mul, tb_max=512)
    jax.block_until_ready(out_big)

    # Correctness checks against the pure-JAX reference
    np.testing.assert_allclose(
        np.asarray(out_plain), np.asarray(mlp_reference(coords, params)),
        rtol=1e-5, atol=1e-5)
    np.testing.assert_allclose(
        np.asarray(out_weighted),
        np.asarray(mlp_reference(coords, params, mul_weights)),
        rtol=1e-5, atol=1e-5)
    np.testing.assert_allclose(
        np.asarray(out_big),
        np.asarray(mlp_reference(big_coords, params, big_mul)),
        rtol=1e-5, atol=1e-5)

    print("KERNEL_OK")
</pallas_src>

<mosaic_0001>
module attributes {stable_mosaic.version = 11 : i64} {
  func.func @_mlp_kernel(%arg0: i32, %arg1: memref<2x128xf32, #tpu.memory_space<vmem>>, %arg2: memref<32x2xf32, #tpu.memory_space<vmem>>, %arg3: memref<32x1xf32, #tpu.memory_space<vmem>>, %arg4: memref<32x32xf32, #tpu.memory_space<vmem>>, %arg5: memref<32x1xf32, #tpu.memory_space<vmem>>, %arg6: memref<32x32xf32, #tpu.memory_space<vmem>>, %arg7: memref<32x1xf32, #tpu.memory_space<vmem>>, %arg8: memref<1x32xf32, #tpu.memory_space<vmem>>, %arg9: memref<1x1xf32, #tpu.memory_space<vmem>>, %arg10: memref<1x128xf32, #tpu.memory_space<vmem>>) attributes {dimension_semantics = [#tpu.dimension_semantics<parallel>], iteration_bounds = array<i64: 1>, scalar_prefetch = 0 : i64, scratch_operands = 0 : i64, tpu.core_type = #tpu.core_type<tc>, window_params = [{transform_indices = @transform_0, window_bounds = array<i64: 2, 128>}, {pipeline_mode = #tpu.pipeline_mode<synchronous>, transform_indices = @transform_1, window_bounds = array<i64: 32, 2>}, {pipeline_mode = #tpu.pipeline_mode<synchronous>, transform_indices = @transform_2, window_bounds = array<i64: 32, 1>}, {pipeline_mode = #tpu.pipeline_mode<synchronous>, transform_indices = @transform_3, window_bounds = array<i64: 32, 32>}, {pipeline_mode = #tpu.pipeline_mode<synchronous>, transform_indices = @transform_4, window_bounds = array<i64: 32, 1>}, {pipeline_mode = #tpu.pipeline_mode<synchronous>, transform_indices = @transform_5, window_bounds = array<i64: 32, 32>}, {pipeline_mode = #tpu.pipeline_mode<synchronous>, transform_indices = @transform_6, window_bounds = array<i64: 32, 1>}, {pipeline_mode = #tpu.pipeline_mode<synchronous>, transform_indices = @transform_7, window_bounds = array<i64: 1, 32>}, {pipeline_mode = #tpu.pipeline_mode<synchronous>, transform_indices = @transform_8, window_bounds = array<i64: 1, 1>}, {transform_indices = @transform_9, window_bounds = array<i64: 1, 128>}]} {
    %c0 = arith.constant 0 : index
    %c0_0 = arith.constant 0 : index
    %0 = vector.load %arg1[%c0, %c0_0] : memref<2x128xf32, #tpu.memory_space<vmem>>, vector<2x128xf32>
    %c0_1 = arith.constant 0 : index
    %c0_2 = arith.constant 0 : index
    %1 = vector.load %arg2[%c0_1, %c0_2] : memref<32x2xf32, #tpu.memory_space<vmem>>, vector<32x2xf32>
    %c0_3 = arith.constant 0 : index
    %c0_4 = arith.constant 0 : index
    %2 = vector.load %arg3[%c0_3, %c0_4] : memref<32x1xf32, #tpu.memory_space<vmem>>, vector<32x1xf32>
    %cst = arith.constant dense<0.000000e+00> : vector<32x128xf32>
    %3 = tpu.matmul %1, %0, %cst {dimension_numbers = #tpu.dot_dimension_numbers<[1], [0], [0], [1], [0, 0, 1, 1], [], []>} : vector<32x2xf32>, vector<2x128xf32>, vector<32x128xf32> -> vector<32x128xf32>
    %4 = vector.broadcast %2 : vector<32x1xf32> to vector<32x128xf32>
    %5 = arith.addf %3, %4 : vector<32x128xf32>
    %cst_5 = arith.constant 0.000000e+00 : f32
    %6 = vector.broadcast %cst_5 : f32 to vector<32x128xf32>
    %7 = arith.maximumf %5, %6 : vector<32x128xf32>
    %c0_6 = arith.constant 0 : index
    %c0_7 = arith.constant 0 : index
    %8 = vector.load %arg4[%c0_6, %c0_7] : memref<32x32xf32, #tpu.memory_space<vmem>>, vector<32x32xf32>
    %c0_8 = arith.constant 0 : index
    %c0_9 = arith.constant 0 : index
    %9 = vector.load %arg5[%c0_8, %c0_9] : memref<32x1xf32, #tpu.memory_space<vmem>>, vector<32x1xf32>
    %cst_10 = arith.constant dense<0.000000e+00> : vector<32x128xf32>
    %10 = tpu.matmul %8, %7, %cst_10 {dimension_numbers = #tpu.dot_dimension_numbers<[1], [0], [0], [1], [0, 0, 1, 1], [], []>} : vector<32x32xf32>, vector<32x128xf32>, vector<32x128xf32> -> vector<32x128xf32>
    %11 = vector.broadcast %9 : vector<32x1xf32> to vector<32x128xf32>
    %12 = arith.addf %10, %11 : vector<32x128xf32>
    %cst_11 = arith.constant 0.000000e+00 : f32
    %13 = vector.broadcast %cst_11 : f32 to vector<32x128xf32>
    %14 = arith.maximumf %12, %13 : vector<32x128xf32>
    %c0_12 = arith.constant 0 : index
    %c0_13 = arith.constant 0 : index
    %15 = vector.load %arg6[%c0_12, %c0_13] : memref<32x32xf32, #tpu.memory_space<vmem>>, vector<32x32xf32>
    %c0_14 = arith.constant 0 : index
    %c0_15 = arith.constant 0 : index
    %16 = vector.load %arg7[%c0_14, %c0_15] : memref<32x1xf32, #tpu.memory_space<vmem>>, vector<32x1xf32>
    %cst_16 = arith.constant dense<0.000000e+00> : vector<32x128xf32>
    %17 = tpu.matmul %15, %14, %cst_16 {dimension_numbers = #tpu.dot_dimension_numbers<[1], [0], [0], [1], [0, 0, 1, 1], [], []>} : vector<32x32xf32>, vector<32x128xf32>, vector<32x128xf32> -> vector<32x128xf32>
    %18 = vector.broadcast %16 : vector<32x1xf32> to vector<32x128xf32>
    %19 = arith.addf %17, %18 : vector<32x128xf32>
    %cst_17 = arith.constant 0.000000e+00 : f32
    %20 = vector.broadcast %cst_17 : f32 to vector<32x128xf32>
    %21 = arith.maximumf %19, %20 : vector<32x128xf32>
    %c0_18 = arith.constant 0 : index
    %c0_19 = arith.constant 0 : index
    %22 = vector.load %arg8[%c0_18, %c0_19] : memref<1x32xf32, #tpu.memory_space<vmem>>, vector<1x32xf32>
    %c0_20 = arith.constant 0 : index
    %c0_21 = arith.constant 0 : index
    %23 = vector.load %arg9[%c0_20, %c0_21] : memref<1x1xf32, #tpu.memory_space<vmem>>, vector<1x1xf32>
    %cst_22 = arith.constant dense<0.000000e+00> : vector<1x128xf32>
    %24 = tpu.matmul %22, %21, %cst_22 {dimension_numbers = #tpu.dot_dimension_numbers<[1], [0], [0], [1], [0, 0, 1, 1], [], []>} : vector<1x32xf32>, vector<32x128xf32>, vector<1x128xf32> -> vector<1x128xf32>
    %25 = vector.broadcast %23 : vector<1x1xf32> to vector<1x128xf32>
    %26 = arith.addf %24, %25 : vector<1x128xf32>
    %c0_23 = arith.constant 0 : index
    %c0_24 = arith.constant 0 : index
    %27 = vector.load %arg10[%c0_23, %c0_24] : memref<1x128xf32, #tpu.memory_space<vmem>>, vector<1x128xf32>
    tpu.vector_store %arg10[%c0_23, %c0_24], %26 {strides = array<i32>} : memref<1x128xf32, #tpu.memory_space<vmem>>, vector<1x128xf32>,
    return
  }
  func.func @transform_0(%arg0: i32) -> (i32, i32) {
    %c0_i32 = arith.constant 0 : i32
    %c0_i32_0 = arith.constant 0 : i32
    return %c0_i32, %arg0 : i32, i32
  }
  func.func @transform_1(%arg0: i32) -> (i32, i32) {
    %c0_i32 = arith.constant 0 : i32
    %c0_i32_0 = arith.constant 0 : i32
    %c0_i32_1 = arith.constant 0 : i32
    return %c0_i32, %c0_i32_0 : i32, i32
  }
  func.func @transform_2(%arg0: i32) -> (i32, i32) {
    %c0_i32 = arith.constant 0 : i32
    %c0_i32_0 = arith.constant 0 : i32
    %c0_i32_1 = arith.constant 0 : i32
    return %c0_i32, %c0_i32_0 : i32, i32
  }
  func.func @transform_3(%arg0: i32) -> (i32, i32) {
    %c0_i32 = arith.constant 0 : i32
    %c0_i32_0 = arith.constant 0 : i32
    %c0_i32_1 = arith.constant 0 : i32
    return %c0_i32, %c0_i32_0 : i32, i32
  }
  func.func @transform_4(%arg0: i32) -> (i32, i32) {
    %c0_i32 = arith.constant 0 : i32
    %c0_i32_0 = arith.constant 0 : i32
    %c0_i32_1 = arith.constant 0 : i32
    return %c0_i32, %c0_i32_0 : i32, i32
  }
  func.func @transform_5(%arg0: i32) -> (i32, i32) {
    %c0_i32 = arith.constant 0 : i32
    %c0_i32_0 = arith.constant 0 : i32
    %c0_i32_1 = arith.constant 0 : i32
    return %c0_i32, %c0_i32_0 : i32, i32
  }
  func.func @transform_6(%arg0: i32) -> (i32, i32) {
    %c0_i32 = arith.constant 0 : i32
    %c0_i32_0 = arith.constant 0 : i32
    %c0_i32_1 = arith.constant 0 : i32
    return %c0_i32, %c0_i32_0 : i32, i32
  }
  func.func @transform_7(%arg0: i32) -> (i32, i32) {
    %c0_i32 = arith.constant 0 : i32
    %c0_i32_0 = arith.constant 0 : i32
    %c0_i32_1 = arith.constant 0 : i32
    return %c0_i32, %c0_i32_0 : i32, i32
  }
  func.func @transform_8(%arg0: i32) -> (i32, i32) {
    %c0_i32 = arith.constant 0 : i32
    %c0_i32_0 = arith.constant 0 : i32
    %c0_i32_1 = arith.constant 0 : i32
    return %c0_i32, %c0_i32_0 : i32, i32
  }
  func.func @transform_9(%arg0: i32) -> (i32, i32) {
    %c0_i32 = arith.constant 0 : i32
    %c0_i32_0 = arith.constant 0 : i32
    return %c0_i32, %arg0 : i32, i32
  }
}

</mosaic_0001>

<bundles_post_ra>
// kernel: tpu_custom_call.1
= control target key start
LH: loop header
LB: loop body
LE: loop exit
PB: predicated region body
PF: predicated region fallthrough
CT: control target
= control target key end

     0   :  { %s829_s0 = inlined_call_operand.vmem [shape: f32[2,128], index: 0, kind: input, shape index: {}]   ;;  %s830_s1 = inlined_call_operand.vmem [shape: f32[32,2], index: 1, kind: input, shape index: {}]   ;;  %s831_s2 = inlined_call_operand.vmem [shape: f32[32,1], index: 2, kind: input, shape index: {}]   ;;  %s832_s3 = inlined_call_operand.vmem [shape: f32[32,32], index: 3, kind: input, shape index: {}]   ;;  %s833_s4 = inlined_call_operand.vmem [shape: f32[32,1], index: 4, kind: input, shape index: {}]   ;;  %s834_s5 = inlined_call_operand.vmem [shape: f32[32,32], index: 5, kind: input, shape index: {}]   ;;  %s835_s6 = inlined_call_operand.vmem [shape: f32[32,1], index: 6, kind: input, shape index: {}]   ;;  %s836_s7 = inlined_call_operand.vmem [shape: f32[1,32], index: 7, kind: input, shape index: {}]   ;;  %s837_s8 = inlined_call_operand.<no memory space> [shape: f32[1,1], index: 8, kind: input, shape index: {}]   ;;  %s838_s9 = inlined_call_operand.hbm [shape: f32[1,128], index: 9, kind: output, shape index: {}]  }
   0x1   :  { %v14_v0 = vstv %s837_s8 }
   0x2   :  { %15 = vst [vmem:[#allocation2] sm:$0x1] %v14_v0 }
   0x3   :  { %v35_v1 = vld [vmem:[%s829_s0] sm:$0x3]  ;;  %vm77_vm0 = vcmask 1041408   ;;  %vm64_vm1 = vcmask 15360   ;;  %v37_v3 = vld [vmem:[%s830_s1 + $0x8] sm:$0xff]  ;;  %v38_v4 = vld [vmem:[%s830_s1 + $0x10] sm:$0xff] }
   0x4   :  { %v36_v2 = vld [vmem:[%s830_s1] sm:$0xff]  ;;  %568 = vmatprep.subr.msk.mxu0 %vm77_vm0, %v35_v1  ;;  %v668_v6 = vmov 0   ;;  %v42_v7 = vld [vmem:[%s831_s2 + $0x10] sm:$0xff]  ;;  %v39_v8 = vld [vmem:[%s830_s1 + $0x18] sm:$0xff] }
   0x5   :  { %570 = vmatprep.mubr.msk.f32.mxu0 %vm64_vm1, %v36_v2  ;;  %v40_v5 = vld [vmem:[%s831_s2] sm:$0xff]  ;;  %569 = vmatpush3.msk.msra.mxu0 %vm77_vm0, %v35_v1  ;;  %v41_v9 = vld [vmem:[%s831_s2 + $0x8] sm:$0xff]  ;;  %v43_v10 = vld [vmem:[%s831_s2 + $0x18] sm:$0xff] }
   0x6   :  { %642 = vset.pattern.permute.xlu0 %v668_v6  ;;  %571 = vmatmul.mubr.msk.f32.vlgmr.msra.gmra.mrb[0].mxu0 %vm64_vm1, %v37_v3 }
   0x7   :  { %46 = vperm.xlu0 %642, %v40_v5   ;;  %573 = vmatprep.mubr.msk.f32.mxu0 %vm64_vm1, %v38_v4 }
   0x8   :  { %643 = vset.pattern.permute.xlu1 %v668_v6 }
   0x9   :  { %56 = vperm.xlu1 %643, %v42_v7  }
   0xa   :  { %16 = vsyncpa [#allocation4], 0  ;;  %574 = vmatmul.mubr.msk.f32.gmra.mrb[2].mxu0 %vm64_vm1, %v39_v8  ;;  %v174_v11 = vld [vmem:[%s833_s4] sm:$0xff]  ;;  %v175_v12 = vld [vmem:[%s833_s4 + $0x8] sm:$0xff]  ;;  %vm198_vm2 = vcmask 261120   ;;  %v669_v0 = vmov 0.0|0.0  }
   0xb   :  { %51 = vperm.xlu0 %642, %v41_v9   ;;  %v176_v13 = vld [vmem:[%s833_s4 + $0x10] sm:$0xff]  ;;  %v177_v14 = vld [vmem:[%s833_s4 + $0x18] sm:$0xff]  ;;  %v304_v15 = vld [vmem:[%s835_s6] sm:$0xff]  ;;  %vm670_vm3 = vmmov 0   ;;  %v671_v1 = vmov 0.0   ;;  %s672_s10 = smov [#allocation3]  }
   0xc   :  { %v305_v16 = vld [vmem:[%s835_s6 + $0x8] sm:$0xff]  ;;  %v306_v17 = vld [vmem:[%s835_s6 + $0x10] sm:$0xff]  ;;  %v307_v18 = vld [vmem:[%s835_s6 + $0x18] sm:$0xff]  ;;  %s520_s2 = sshll.u32 %s672_s10, 4  ;;  %s521_s2 = int_to_ptr.vmem [resolvable:$true] %s520_s2 }
   0xd   :  { %61 = vperm.xlu1 %643, %v43_v10   ;;  %v430_v19 = vld [vmem:[#allocation2] sm:$0x1]  ;;  %v171_v39 = vld [vmem:[%s832_s3 + $0x8] sm:$0xff]  ;;  %v172_v40 = vld [vmem:[%s832_s3 + $0x10] sm:$0xff]  ;;  %s644_s11 = scalar_lea.vmem %s521_s2, 16  ;;  %s648_s12 = scalar_lea.vmem %s521_s2, 32 }
   0xe   :  { %v170_v20 = vld [vmem:[%s832_s3] sm:$0xff]  ;;  %v173_v41 = vld [vmem:[%s832_s3 + $0x18] sm:$0xff]  ;;  %v301_v61 = vld [vmem:[%s834_s5 + $0x8] sm:$0xff]  ;;  %p645_p0 = scmp.ne.s32.totalorder %s521_s2, %s644_s11  ;;  %p649_p1 = scmp.lt.s32.totalorder %s521_s2, %s521_s2 }
   0xf   :  { %180 = vperm.xlu0 %642, %v174_v11   ;;  %584 = vmatprep.mubr.msk.f32.mxu1 %vm198_vm2, %v170_v20  ;;  %v300_v42 = vld [vmem:[%s834_s5] sm:$0xff]  ;;  %v302_v62 = vld [vmem:[%s834_s5 + $0x10] sm:$0xff]  ;;  %v303_v63 = vld [vmem:[%s834_s5 + $0x18] sm:$0xff]  ;;  %p650_p2 = scmp.lt.s32.totalorder %s648_s12, %s644_s11 }
  0x10   :  { %598 = vmatprep.mubr.msk.f32.mxu0 %vm198_vm2, %v300_v42  ;;  %v429_v20 = vld [vmem:[%s836_s7] sm:$0x1] }
  0x11   :  { %185 = vperm.xlu1 %643, %v175_v12   ;;  %p651_p3 = por %p650_p2, %p649_p1 }
  0x13   :  { %190 = vperm.xlu0 %642, %v176_v13   ;;  %p652_p4 = pnand %p651_p3, %p645_p0 }
  0x15   :  { %195 = vperm.xlu1 %643, %v177_v14  }
  0x17   :  { %310 = vperm.xlu0 %642, %v304_v15  }
  0x19   :  { %315 = vperm.xlu1 %643, %v305_v16  }
  0x1b   :  { %320 = vperm.xlu0 %642, %v306_v17  }
  0x1d   :  { %325 = vperm.xlu1 %643, %v307_v18  }
  0x1f   :  { %433 = vperm.xlu0 %642, %v430_v19  }
  0x86   :  { %v47_v21 = vpop.permute.xlu0 %46 }
  0x88   :  { %v57_v22 = vpop.permute.xlu1 %56 }
  0x8a   :  { %v52_v23 = vpop.permute.xlu0 %51 }
  0x8c   :  { %v62_v29 = vpop.permute.xlu1 %61 }
  0x8e   :  { %v181_v44 = vpop.permute.xlu0 %180 }
  0x90   :  { %v186_v43 = vpop.permute.xlu1 %185 }
  0x92   :  { %v191_v53 = vpop.permute.xlu0 %190 }
  0x94   :  { %v196_v50 = vpop.permute.xlu1 %195 }
  0x96   :  { %v311_v3 = vpop.permute.xlu0 %310 }
  0x98   :  { %v316_v2 = vpop.permute.xlu1 %315 }
  0x9a   :  { %v321_v12 = vpop.permute.xlu0 %320 }
  0x9c   :  { %v326_v9 = vpop.permute.xlu1 %325 }
  0xd9   :  { %v572_v24 = vpop.f32.mrb[0].mxu0 }
  0xda   :  { %v153_v25 = vadd.f32 %v572_v24, %v52_v23  ;;  %v147_v26 = vpop.f32.mrb[1].mxu0  ;;  %v434_v24 = vpop.permute.xlu0 %433 }
  0xdb   :  { %v148_v27 = vadd.f32 %v147_v26, %v47_v21  ;;  %v436_v21 = vlaneseq }
  0xdc   :  { %v167_v28 = vmax.f32 %v153_v25, 0.0 }
  0xdd   :  { %v166_v30 = vmax.f32 %v148_v27, 0.0  ;;  %v575_v31 = vpop.f32.mrb[2].mxu0 }
  0xde   :  { %v163_v32 = vadd.f32 %v575_v31, %v62_v29  ;;  %v157_v33 = vpop.f32.mrb[3].mxu0 }
  0xdf   :  { %v158_v34 = vadd.f32 %v157_v33, %v57_v22  ;;  %v615_v35 = vpack.c.bf16 %v167_v28, %v166_v30  ;;  %v437_v22 = vshrl.u32 %v436_v21, 7 }
  0xe0   :  { %v169_v36 = vmax.f32 %v163_v32, 0.0 }
  0xe1   :  { %v168_v37 = vmax.f32 %v158_v34, 0.0  ;;  %616 = vmatprep.subr.bf16.mxu1 %v615_v35  ;;  %v438_v23 = vsub.s32 0, %v437_v22 }
  0xe2   :  { %618 = vmatpush3.bf16.msra.mxu1 %v615_v35 }
  0xe3   :  { %v619_v38 = vpack.c.bf16 %v169_v36, %v168_v37  ;;  %v439_v25 = vrot.slane %v434_v24, %v438_v23 }
  0xe5   :  { %620 = vmatprep.subr.bf16.mxu1 %v619_v38 }
  0xe6   :  { %622 = vmatpush3.bf16.msra.mxu1 %v619_v38 }
  0xe7   :  { %631 = vmatprep.subr.bf16.mxu1 %v669_v0 }
  0xe9   :  { %585 = vmatmul.mubr.msk.f32.vlgmr.msra.gmra.mrb[0].mxu1 %vm198_vm2, %v171_v39 }
  0xea   :  { %587 = vmatprep.mubr.msk.f32.mxu1 %vm198_vm2, %v172_v40 }
  0xed   :  { %588 = vmatmul.mubr.msk.f32.gmra.mrb[2].mxu1 %vm198_vm2, %v173_v41 }
  0xee   :  { %612 = vmatprep.mubr.msk.f32.mxu1 %vm670_vm3, %v671_v1 }
 0x1bc   :  { %v586_v45 = vpop.f32.mrb[0].mxu1 }
 0x1bd   :  { %v283_v46 = vadd.f32 %v586_v45, %v186_v43  ;;  %v277_v47 = vpop.f32.mrb[1].mxu1 }
 0x1be   :  { %v278_v48 = vadd.f32 %v277_v47, %v181_v44 }
 0x1bf   :  { %v297_v49 = vmax.f32 %v283_v46, 0.0 }
 0x1c0   :  { %v296_v51 = vmax.f32 %v278_v48, 0.0  ;;  %v589_v52 = vpop.f32.mrb[2].mxu1 }
 0x1c1   :  { %v293_v54 = vadd.f32 %v589_v52, %v196_v50  ;;  %v287_v55 = vpop.f32.mrb[3].mxu1 }
 0x1c2   :  { %v623_v56 = vpack.c.bf16 %v297_v49, %v296_v51  ;;  %v288_v57 = vadd.f32 %v287_v55, %v191_v53 }
 0x1c3   :  { %v299_v58 = vmax.f32 %v293_v54, 0.0 }
 0x1c4   :  { %v298_v59 = vmax.f32 %v288_v57, 0.0  ;;  %624 = vmatprep.subr.bf16.mxu0 %v623_v56 }
 0x1c5   :  { %626 = vmatpush3.bf16.msra.mxu0 %v623_v56 }
 0x1c6   :  { %v627_v60 = vpack.c.bf16 %v299_v58, %v298_v59 }
 0x1c8   :  { %628 = vmatprep.subr.bf16.mxu0 %v627_v60 }
 0x1c9   :  { %630 = vmatpush3.bf16.msra.mxu0 %v627_v60 }
 0x1cc   :  { %599 = vmatmul.mubr.msk.f32.vlgmr.msra.gmra.mrb[4].mxu0 %vm198_vm2, %v301_v61 }
 0x1cd   :  { %601 = vmatprep.mubr.msk.f32.mxu0 %vm198_vm2, %v302_v62 }
 0x1d0   :  { %602 = vmatmul.mubr.msk.f32.gmra.mrb[6].mxu0 %vm198_vm2, %v303_v63 }
 0x29f   :  { %v600_v4 = vpop.f32.mrb[4].mxu0 }
 0x2a0   :  { %v412_v5 = vadd.f32 %v600_v4, %v316_v2  ;;  %v406_v6 = vpop.f32.mrb[5].mxu0 }
 0x2a1   :  { %v407_v7 = vadd.f32 %v406_v6, %v311_v3 }
 0x2a2   :  { %v426_v8 = vmax.f32 %v412_v5, 0.0 }
 0x2a3   :  { %v425_v10 = vmax.f32 %v407_v7, 0.0  ;;  %v603_v11 = vpop.f32.mrb[6].mxu0 }
 0x2a4   :  { %v422_v13 = vadd.f32 %v603_v11, %v326_v9  ;;  %v416_v14 = vpop.f32.mrb[7].mxu0 }
 0x2a5   :  { %v632_v15 = vpack.c.bf16 %v426_v8, %v425_v10  ;;  %v417_v16 = vadd.f32 %v416_v14, %v321_v12 }
 0x2a6   :  { %v428_v17 = vmax.f32 %v422_v13, 0.0 }
 0x2a7   :  { %v427_v18 = vmax.f32 %v417_v16, 0.0  ;;  %633 = vmatpush3.bf16.msra.mxu1 %v632_v15 }
 0x2a8   :  { %634 = vmatprep.subr.bf16.mxu1 %v669_v0 }
 0x2a9   :  { %v635_v19 = vpack.c.bf16 %v428_v17, %v427_v18 }
 0x2ab   :  { %636 = vmatpush3.bf16.msra.mxu1 %v635_v19 }
 0x2ae   :  { %613 = vmatmul.mubr.msk.f32.vlgmr.msra.gmra.mrb[4].mxu1 %vm198_vm2, %v429_v20 }
 0x381   :  { %v509_v26 = vpop.f32.mrb[4].mxu1 }
 0x382   :  { %v510_v27 = vadd.f32 %v509_v26, %v439_v25  ;;  %v614_v28 = vpop.f32.mrb[5].mxu1 }
 0x384   :  { %513 = vst [vmem:[#allocation3] sm:$0x1] %v510_v27 }
 0x385   :  { %655 = shalt.err (!%p652_p4)
}
 0x386   :  { %s656_s14 = scalar_lea.hbm %s838_s9, 16 }
 0x387   :  { %p657_p5 = scmp.ne.s32.totalorder %s838_s9, %s656_s14  ;;  %p660_p6 = scmp.lt.u32.totalorder %s656_s14, %s838_s9 }
 0x389   :  { %p662_p7 = pnand %p660_p6, %p657_p5 }
 0x38b   :  { %665 = shalt.err (!%p662_p7)
}
 0x38c   :  { %523 = dma.vmem_to_hbm [thread:$0]  %s521_s2, 16, %s838_s9, [#allocation4]  }
 0x38d   :  { %666 = dma.done.wait [#allocation4], 16  }
 0x38e   :  { %667 = vsyncadd [#allocation4], 4294967280 }
 0x38f   :  { %527 = vsyncpa [#allocation4], 1 }

</bundles_post_ra>
